<compile_context>
chip_gen: v6e
topology: v6e:2x2x1
jax: 0.10.0
libtpu: 0.0.40
codegen_flags: <defaults>
</compile_context>

<pallas_src>
import functools

import jax
import jax.numpy as jnp
from jax.experimental import pallas as pl
from jax.experimental.pallas import tpu as pltpu


def _mlp_kernel(x_ref, w1t_ref, b1_ref, w2_ref, b2_ref, o_ref):
    """x:(TB,F)  w1t:(F,H)  b1:(1,H)  w2:(H,1)  b2(SMEM):(1,1)  ->  o:(TB,1)."""
    # layer_1 on the MXU with both operands in natural layout (contraction dim F sits
    # on x's lanes / w1t's sublanes -> no relayout of the streamed tile).
    h = jnp.dot(x_ref[...], w1t_ref[...], preferred_element_type=jnp.float32)   # (TB, H)
    h = jnp.maximum(h + b1_ref[...], 0.0)            # bias + ReLU on the VPU (f32)
    # Dropout(p=0.7) is identity in eval/inference mode.
    # TODO(synk): training-mode dropout (pltpu.prng_seed + pltpu.prng_random_bits mask
    #             scaled by 1/(1-p)) is not implemented.
    # layer_out (out_features == 1): width-1 MXU matmul keeps VALU/XLU slots free.
    out = jnp.dot(h, w2_ref[...], preferred_element_type=jnp.float32)           # (TB, 1)
    o_ref[...] = (out + b2_ref[0, 0]).astype(o_ref.dtype)


def _pad128(n):
    return ((int(n) + 127) // 128) * 128


_VMEM_LIMIT_BYTES = 32 * 1024 * 1024      # explicit scoped-VMEM limit (safe on v5e/v6e/v7x)
_STREAM_BUDGET_BYTES = 18 * 1024 * 1024   # budget for double-buffered blocks + f32 temps


def _pick_tile_b(batch, in_feature, n_hidden, x_itemsize):
    """Padding-aware batch-tile selection (last dim pads to 128 lanes in VMEM)."""
    per_row_bytes = (
        2 * _pad128(in_feature) * x_itemsize   # x block, double-buffered, lane-padded
        + 2 * _pad128(1) * 4                   # (TB, 1) f32 output block, double-buffered
        + 2 * _pad128(n_hidden) * 4            # h / relu f32 intermediates
    )
    cap = max(128, (_STREAM_BUDGET_BYTES // per_row_bytes) // 128 * 128)
    cap = min(cap, 32768)
    if batch <= 256:
        return int(batch)                      # single full-extent block (always legal)
    # Guarantee >= 2 grid steps so the "parallel" batch axis actually shards across
    # both TensorCores on v7x even when the whole batch would fit one tile.
    half = ((-(-batch // 2)) + 127) // 128 * 128
    return int(min(cap, half))


@functools.partial(jax.jit, static_argnames=("tile_b",))
def binary_classification_forward(x, w1, b1, w2, b2, *, tile_b=None):
    """x: (B, F); w1: (H, F); b1: (H,); w2: (1, H); b2: (1,)  (PyTorch layouts).

    Returns (B, 1) in x.dtype, matching BinaryClassification.forward in eval mode.
    """
    batch, in_feature = x.shape
    n_hidden = w1.shape[0]

    if tile_b is None:
        tile_b = _pick_tile_b(batch, in_feature, n_hidden, x.dtype.itemsize)
    if batch <= tile_b:
        tile_b = batch      # single block == full array dims (always a legal block)
    else:
        assert tile_b % 8 == 0, "tile_b must be a multiple of 8 when batch > tile_b"
    grid = (pl.cdiv(batch, tile_b),)   # ragged tail handled by Pallas block clipping

    # Only the tiny resident weights are transposed/reshaped (never x, never in HBM bulk).
    w1t = w1.T.astype(x.dtype)                         # (F, H): resident in VMEM
    b1_row = b1.reshape(1, n_hidden).astype(jnp.float32)
    w2_col = w2.reshape(n_hidden, 1).astype(jnp.float32)
    b2_s = b2.reshape(1, 1).astype(jnp.float32)        # scalar -> SMEM

    w_bytes = w1t.size * w1t.dtype.itemsize + (2 * n_hidden + 1) * 4
    cost = pl.CostEstimate(
        flops=2 * batch * in_feature * n_hidden + 2 * batch * n_hidden,
        transcendentals=0,
        bytes_accessed=batch * in_feature * x.dtype.itemsize
        + w_bytes
        + batch * x.dtype.itemsize,
    )

    out = pl.pallas_call(
        _mlp_kernel,
        out_shape=jax.ShapeDtypeStruct((batch, 1), x.dtype),
        grid=grid,
        in_specs=[
            pl.BlockSpec((tile_b, in_feature), lambda i: (i, 0)),    # x: streamed over batch
            pl.BlockSpec((in_feature, n_hidden), lambda i: (0, 0)),  # w1^T: resident
            pl.BlockSpec((1, n_hidden), lambda i: (0, 0)),           # b1: resident
            pl.BlockSpec((n_hidden, 1), lambda i: (0, 0)),           # w2 column: resident
            pl.BlockSpec(memory_space=pltpu.MemorySpace.SMEM),       # b2: SMEM scalar
        ],
        out_specs=pl.BlockSpec((tile_b, 1), lambda i: (i, 0)),
        compiler_params=pltpu.CompilerParams(
            dimension_semantics=("parallel",),   # v7x: batch grid shards across both TCs
            vmem_limit_bytes=_VMEM_LIMIT_BYTES,
        ),
        cost_estimate=cost,
    )(x, w1t, b1_row, w2_col, b2_s)

    return out


def _init_params(key, in_feature, n_hidden):
    """nn.Linear-style init: U(-1/sqrt(fan_in), 1/sqrt(fan_in))."""
    k1, k2, k3, k4 = jax.random.split(key, 4)
    bound1 = 1.0 / jnp.sqrt(in_feature)
    bound2 = 1.0 / jnp.sqrt(n_hidden)
    w1 = jax.random.uniform(k1, (n_hidden, in_feature), jnp.float32, -bound1, bound1)
    b1 = jax.random.uniform(k2, (n_hidden,), jnp.float32, -bound1, bound1)
    w2 = jax.random.uniform(k3, (1, n_hidden), jnp.float32, -bound2, bound2)
    b2 = jax.random.uniform(k4, (1,), jnp.float32, -bound2, bound2)
    return w1, b1, w2, b2


if __name__ == "__main__":
    key = jax.random.PRNGKey(0)
    k_x, k_p, k_x2, k_x3, k_x4 = jax.random.split(key, 5)

    in_feature, n_hidden = 16, 32
    w1, b1, w2, b2 = _init_params(k_p, in_feature, n_hidden)

    def ref_forward(xx):  # eval-mode dropout == identity
        return jnp.maximum(xx @ w1.T + b1, 0.0) @ w2.T + b2

    def check(out, xx, tag):
        assert out.shape == (xx.shape[0], 1), f"bad shape {tag}"
        # Tolerance accommodates possible bf16-pass MXU rounding of f32 operands.
        assert jnp.allclose(out, ref_forward(xx), atol=2e-2, rtol=2e-2), f"mismatch {tag}"

    # 1) Small single-block case (B <= tile).
    x = jax.random.normal(k_x, (8, in_feature), jnp.float32)
    out = jax.block_until_ready(binary_classification_forward(x, w1, b1, w2, b2))
    check(out, x, "B=8")

    # 2) Multi-block grid path (batch evenly divided by the tile).
    x2 = jax.random.normal(k_x2, (384, in_feature), jnp.float32)
    out2 = jax.block_until_ready(
        binary_classification_forward(x2, w1, b1, w2, b2, tile_b=128))
    check(out2, x2, "B=384")

    # 3) Multi-block grid path with a ragged tail (cdiv-sized grid, clipped last block).
    x3 = jax.random.normal(k_x3, (300, in_feature), jnp.float32)
    out3 = jax.block_until_ready(
        binary_classification_forward(x3, w1, b1, w2, b2, tile_b=128))
    check(out3, x3, "B=300")

    # 4) Auto tile selection (padding-aware budget; >=2 grid steps for megacore sharding).
    x4 = jax.random.normal(k_x4, (512, in_feature), jnp.float32)
    out4 = jax.block_until_ready(binary_classification_forward(x4, w1, b1, w2, b2))
    check(out4, x4, "B=512 auto")

    print("KERNEL_OK")
</pallas_src>

<mosaic_0001>
module attributes {stable_mosaic.version = 11 : i64} {
  func.func @_mlp_kernel(%arg0: i32, %arg1: memref<8x16xf32, #tpu.memory_space<vmem>>, %arg2: memref<16x32xf32, #tpu.memory_space<vmem>>, %arg3: memref<1x32xf32, #tpu.memory_space<vmem>>, %arg4: memref<32x1xf32, #tpu.memory_space<vmem>>, %arg5: memref<1x1xf32, #tpu.memory_space<smem>>, %arg6: memref<8x1xf32, #tpu.memory_space<vmem>>) attributes {dimension_semantics = [#tpu.dimension_semantics<parallel>], iteration_bounds = array<i64: 1>, scalar_prefetch = 0 : i64, scratch_operands = 0 : i64, tpu.core_type = #tpu.core_type<tc>, window_params = [{transform_indices = @transform_0, window_bounds = array<i64: 8, 16>}, {pipeline_mode = #tpu.pipeline_mode<synchronous>, transform_indices = @transform_1, window_bounds = array<i64: 16, 32>}, {pipeline_mode = #tpu.pipeline_mode<synchronous>, transform_indices = @transform_2, window_bounds = array<i64: 1, 32>}, {pipeline_mode = #tpu.pipeline_mode<synchronous>, transform_indices = @transform_3, window_bounds = array<i64: 32, 1>}, {transform_indices = @transform_4, window_bounds = array<i64: 1, 1>}, {transform_indices = @transform_5, window_bounds = array<i64: 8, 1>}]} {
    %c0 = arith.constant 0 : index
    %c0_0 = arith.constant 0 : index
    %0 = vector.load %arg1[%c0, %c0_0] : memref<8x16xf32, #tpu.memory_space<vmem>>, vector<8x16xf32>
    %c0_1 = arith.constant 0 : index
    %c0_2 = arith.constant 0 : index
    %1 = vector.load %arg2[%c0_1, %c0_2] : memref<16x32xf32, #tpu.memory_space<vmem>>, vector<16x32xf32>
    %cst = arith.constant dense<0.000000e+00> : vector<8x32xf32>
    %2 = tpu.matmul %0, %1, %cst {dimension_numbers = #tpu.dot_dimension_numbers<[1], [0], [0], [1], [0, 0, 1, 1], [], []>} : vector<8x16xf32>, vector<16x32xf32>, vector<8x32xf32> -> vector<8x32xf32>
    %c0_3 = arith.constant 0 : index
    %c0_4 = arith.constant 0 : index
    %3 = vector.load %arg3[%c0_3, %c0_4] : memref<1x32xf32, #tpu.memory_space<vmem>>, vector<1x32xf32>
    %4 = vector.broadcast %3 : vector<1x32xf32> to vector<8x32xf32>
    %5 = arith.addf %2, %4 : vector<8x32xf32>
    %cst_5 = arith.constant 0.000000e+00 : f32
    %6 = vector.broadcast %cst_5 : f32 to vector<8x32xf32>
    %7 = arith.maximumf %5, %6 : vector<8x32xf32>
    %c0_6 = arith.constant 0 : index
    %c0_7 = arith.constant 0 : index
    %8 = vector.load %arg4[%c0_6, %c0_7] : memref<32x1xf32, #tpu.memory_space<vmem>>, vector<32x1xf32>
    %cst_8 = arith.constant dense<0.000000e+00> : vector<8x1xf32>
    %9 = tpu.matmul %7, %8, %cst_8 {dimension_numbers = #tpu.dot_dimension_numbers<[1], [0], [0], [1], [0, 0, 1, 1], [], []>} : vector<8x32xf32>, vector<32x1xf32>, vector<8x1xf32> -> vector<8x1xf32>
    %c0_9 = arith.constant 0 : index
    %c0_10 = arith.constant 0 : index
    %10 = memref.load %arg5[%c0_9, %c0_10] : memref<1x1xf32, #tpu.memory_space<smem>>
    %11 = vector.broadcast %10 : f32 to vector<8x1xf32>
    %12 = arith.addf %9, %11 : vector<8x1xf32>
    %c0_11 = arith.constant 0 : index
    %c0_12 = arith.constant 0 : index
    %13 = vector.load %arg6[%c0_11, %c0_12] : memref<8x1xf32, #tpu.memory_space<vmem>>, vector<8x1xf32>
    tpu.vector_store %arg6[%c0_11, %c0_12], %12 {strides = array<i32>} : memref<8x1xf32, #tpu.memory_space<vmem>>, vector<8x1xf32>,
    return
  }
  func.func @transform_0(%arg0: i32) -> (i32, i32) {
    %c0_i32 = arith.constant 0 : i32
    %c0_i32_0 = arith.constant 0 : i32
    return %arg0, %c0_i32 : i32, i32
  }
  func.func @transform_1(%arg0: i32) -> (i32, i32) {
    %c0_i32 = arith.constant 0 : i32
    %c0_i32_0 = arith.constant 0 : i32
    %c0_i32_1 = arith.constant 0 : i32
    return %c0_i32, %c0_i32_0 : i32, i32
  }
  func.func @transform_2(%arg0: i32) -> (i32, i32) {
    %c0_i32 = arith.constant 0 : i32
    %c0_i32_0 = arith.constant 0 : i32
    %c0_i32_1 = arith.constant 0 : i32
    return %c0_i32, %c0_i32_0 : i32, i32
  }
  func.func @transform_3(%arg0: i32) -> (i32, i32) {
    %c0_i32 = arith.constant 0 : i32
    %c0_i32_0 = arith.constant 0 : i32
    %c0_i32_1 = arith.constant 0 : i32
    return %c0_i32, %c0_i32_0 : i32, i32
  }
  func.func @transform_4(%arg0: i32) -> (i32, i32) {
    %c0_i32 = arith.constant 0 : i32
    %c0_i32_0 = arith.constant 0 : i32
    %c0_i32_1 = arith.constant 0 : i32
    return %c0_i32, %c0_i32_0 : i32, i32
  }
  func.func @transform_5(%arg0: i32) -> (i32, i32) {
    %c0_i32 = arith.constant 0 : i32
    %c0_i32_0 = arith.constant 0 : i32
    return %arg0, %c0_i32 : i32, i32
  }
}

</mosaic_0001>

<bundles_post_ra>
// kernel: binary_classification_forward.1
= control target key start
LH: loop header
LB: loop body
LE: loop exit
PB: predicated region body
PF: predicated region fallthrough
CT: control target
= control target key end

     0   :  { %v223_v0 = vmov 0.0   ;;  %vm224_vm0 = vmmov 0   ;;  %vm31_vm1 = vcmask 130048   ;;  %vm112_vm2 = vcmask 261120   ;;  %s285_s1 = inlined_call_operand.vmem [shape: f32[16,32], index: 1, kind: input, shape index: {}]   ;;  %s286_s0 = inlined_call_operand.vmem [shape: f32[8,16], index: 0, kind: input, shape index: {}]   ;;  %s287_s3 = inlined_call_operand.vmem [shape: f32[32,1], index: 3, kind: input, shape index: {}]   ;;  %s288_s2 = inlined_call_operand.vmem [shape: f32[1,32], index: 2, kind: input, shape index: {}]   ;;  %s289_s4 = inlined_call_operand.<no memory space> [shape: f32[1,1], index: 4, kind: input, shape index: {}]   ;;  %s290_s5 = inlined_call_operand.vmem [shape: f32[8,1], index: 5, kind: output, shape index: {}]  }
   0x1   :  { %203 = vmatprep.subr.mxu0 %v223_v0  ;;  %v23_v1 = vld [vmem:[%s285_s1 + $0x8] sm:$0xff]  ;;  %v22_v2 = vld [vmem:[%s285_s1] sm:$0xff]  ;;  %207 = vmatprep.mubr.msk.f32.mxu0 %vm224_vm0, %v223_v0  ;;  %v109_v4 = vld [vmem:[%s287_s3 + $0x18] sm:$0xff]  ;;  %v111_v13 = vstv %s289_s4  ;;  %vm186_vm3 = vcmask 7168  }
   0x2   :  { %204 = vmatpush3.msra.mxu0 %v23_v1  ;;  %v21_v3 = vld [vmem:[%s286_s0] sm:$0xff]  ;;  %210 = vmatprep.subr.mxu1 %v223_v0  ;;  %v108_v5 = vld [vmem:[%s287_s3 + $0x10] sm:$0xff]  ;;  %v107_v6 = vld [vmem:[%s287_s3 + $0x8] sm:$0xff] }
   0x3   :  { %205 = vmatprep.subr.mxu0 %v223_v0  ;;  %211 = vmatpush3.msra.mxu1 %v109_v4  ;;  %v106_v7 = vld [vmem:[%s287_s3] sm:$0xff] }
   0x4   :  { %206 = vmatpush3.msra.mxu0 %v22_v2  ;;  %212 = vmatprep.subr.mxu1 %v223_v0  ;;  %v192_v8 = vld [vmem:[%s288_s2] ss:$0 sm:$0xff] }
   0x5   :  { %208 = vmatmul.mubr.msk.f32.vlgmr.msra.gmra.mxu0 %vm31_vm1, %v21_v3  ;;  %218 = vmatprep.mubr.msk.f32.mxu1 %vm224_vm0, %v223_v0 }
   0x6   :  { %213 = vmatpush3.msra.mxu1 %v108_v5 }
   0x7   :  { %214 = vmatprep.subr.mxu1 %v223_v0 }
   0x8   :  { %215 = vmatpush3.msra.mxu1 %v107_v6 }
   0x9   :  { %216 = vmatprep.subr.mxu1 %v223_v0 }
   0xa   :  { %217 = vmatpush3.msra.mxu1 %v106_v7 }
  0xc5   :  { %v101_v9 = vpop.f32.mrf.mxu0 }
  0xc6   :  { %v102_v10 = vadd.f32 %v192_v8, %v101_v9 }
  0xc7   :  { %v209_v11 = vpop.f32.mrf.mxu0 }
  0xc8   :  { %v105_v12 = vmax.f32 %v102_v10, 0.0 }
  0xca   :  { %219 = vmatmul.mubr.msk.f32.vlgmr.msra.gmra.mxu1 %vm112_vm2, %v105_v12 }
 0x18a   :  { %v182_v14 = vpop.f32.mrf.mxu1 }
 0x18b   :  { %v183_v15 = vadd.f32 %v182_v14, %v111_v13 }
 0x18c   :  { %v220_v16 = vpop.f32.mrf.mxu1 }
 0x18d   :  { %187 = vst.msk [vmem:[%s290_s5] sm:$0xff] %vm186_vm3, %v183_v15 }

</bundles_post_ra>
